<compile_context>
chip_gen: v7x
topology: tpu7x:2x2x1
jax: 0.10.0
libtpu: 0.0.40
codegen_flags: <defaults>
</compile_context>

<pallas_src>
import functools

import jax
import jax.numpy as jnp
from jax import lax
from jax.experimental import pallas as pl
from jax.experimental.pallas import tpu as pltpu

LANE = 128
SUBLANE = 8


def _round_up(n: int, m: int) -> int:
    return ((n + m - 1) // m) * m


def _cls_head_kernel(x_ref, g_ref, b_ref, w_ref, bias_ref, o_ref, *, eps):
    # x_ref: (tm, emb) tile of CLS tokens (gather fused into the block DMA).
    x = x_ref[...].astype(jnp.float32)

    # LayerNorm, f32 stats. rsqrt runs on the nearly-free EUP slot over a
    # [tm, 1] vector; gamma is folded into one scale so the remaining
    # full-tile VPU work is a subtract and a single multiply-add.
    mean = jnp.mean(x, axis=-1, keepdims=True)
    xc = x - mean
    var = jnp.mean(xc * xc, axis=-1, keepdims=True)
    rstd = lax.rsqrt(var + eps)                          # [tm, 1]  (EUP)
    scale = rstd * g_ref[...].astype(jnp.float32)        # [tm, emb]
    y = xc * scale + b_ref[...].astype(jnp.float32)

    # Classifier matmul on the MXU: bf16 operands, f32 accumulation.
    out = jnp.dot(y.astype(w_ref.dtype), w_ref[...],
                  preferred_element_type=jnp.float32)
    out = out + bias_ref[...].astype(jnp.float32)
    o_ref[...] = out.astype(o_ref.dtype)


def prepare_params(gamma, beta, w, bias, *, matmul_dtype=jnp.bfloat16):
    """One-time parameter prep (NOT per forward call).

    Pads the class dim up to a full 128-lane register (unmasked `vst` stores)
    and casts W to the MXU-native dtype. gamma/beta are reshaped to (1, emb).
    """
    emb, n_classes = w.shape
    nc_pad = _round_up(max(n_classes, LANE), LANE)
    w_p = jnp.pad(w, ((0, 0), (0, nc_pad - n_classes))).astype(matmul_dtype)
    bias_p = jnp.pad(bias, (0, nc_pad - n_classes)).reshape(1, nc_pad)
    bias_p = bias_p.astype(jnp.float32)
    return dict(gamma=gamma.reshape(1, emb), beta=beta.reshape(1, emb),
                w=w_p, bias=bias_p, n_classes=n_classes)


def classification_head(x, params, *, eps=1e-5, tm=256):
    """x: [B, S, emb]; params: output of prepare_params. Returns [B, n_classes]."""
    B, S, emb = x.shape
    gamma2, beta2 = params["gamma"], params["beta"]
    w_p, bias_p = params["w"], params["bias"]
    n_classes = params["n_classes"]
    nc_pad = w_p.shape[1]
    assert gamma2.shape == (1, emb) and w_p.shape[0] == emb

    # ---- Row tiling: balanced tiles (bounded padding waste) and >=2 grid
    # steps whenever there are >=2 sublane groups so v7x's second TC gets work.
    if B <= SUBLANE:
        tm_eff = B                      # full-dim block, grid of 1
    else:
        b8 = _round_up(B, SUBLANE)
        tm_cap = max(SUBLANE, min(tm, b8))
        if b8 >= 2 * SUBLANE:
            tm_cap = min(tm_cap, _round_up(pl.cdiv(b8, 2), SUBLANE))
        n_bal = pl.cdiv(b8, tm_cap)
        tm_eff = _round_up(pl.cdiv(b8, n_bal), SUBLANE)
    n_tiles = pl.cdiv(B, tm_eff)

    # ---- Fuse the CLS-token gather into the kernel DMA: view x as
    # [B, S*emb]; the first `emb` lanes of every row are exactly x[:, 0, :].
    if emb % LANE == 0:
        x_in = x.reshape(B, S * emb)            # metadata-only reshape
    else:
        # TODO(synk): non-lane-aligned emb falls back to one XLA slice.
        x_in = x[:, 0, :]
    x_spec = pl.BlockSpec((tm_eff, emb), lambda i: (i, 0))

    # ---- VMEM budget (assume double-buffering of everything, 2x margin).
    needed = (2 * tm_eff * emb * x.dtype.itemsize
              + 2 * tm_eff * nc_pad * x.dtype.itemsize
              + 2 * emb * nc_pad * w_p.dtype.itemsize
              + 2 * (nc_pad + 2 * emb) * 4)
    vmem_limit = int(min(max(2 * needed + (4 << 20), 32 << 20), 64 << 20))

    out_p = pl.pallas_call(
        functools.partial(_cls_head_kernel, eps=eps),
        out_shape=jax.ShapeDtypeStruct((B, nc_pad), x.dtype),
        grid_spec=pltpu.PrefetchScalarGridSpec(
            num_scalar_prefetch=0,
            grid=(n_tiles,),
            in_specs=[
                x_spec,                                          # CLS tile
                pl.BlockSpec((1, emb), lambda i: (0, 0)),        # gamma
                pl.BlockSpec((1, emb), lambda i: (0, 0)),        # beta
                pl.BlockSpec((emb, nc_pad), lambda i: (0, 0)),   # W (resident)
                pl.BlockSpec((1, nc_pad), lambda i: (0, 0)),     # bias
            ],
            out_specs=pl.BlockSpec((tm_eff, nc_pad), lambda i: (i, 0)),
        ),
        compiler_params=pltpu.CompilerParams(
            dimension_semantics=("parallel",),
            vmem_limit_bytes=vmem_limit),
    )(x_in, gamma2, beta2, w_p, bias_p)

    # TODO(synk): consumers that accept a 128-lane-padded logits slab (e.g. a
    # fused argmax/softmax) could skip this final slice copy.
    return out_p[:, :n_classes]


def init_params(key, emb_size, n_classes, dtype=jnp.float32):
    """PyTorch-style init: LayerNorm gamma=1/beta=0; Linear uniform +-1/sqrt(fan_in)."""
    k1, k2 = jax.random.split(key)
    lim = emb_size ** -0.5
    gamma = jnp.ones((emb_size,), dtype)
    beta = jnp.zeros((emb_size,), dtype)
    # Stored as [in, out] (transpose of PyTorch's [out, in] weight layout).
    w = jax.random.uniform(k1, (emb_size, n_classes), dtype, -lim, lim)
    bias = jax.random.uniform(k2, (n_classes,), dtype, -lim, lim)
    return gamma, beta, w, bias


if __name__ == "__main__":
    key = jax.random.PRNGKey(0)
    kx, kp = jax.random.split(key)

    B, S, emb_size, n_classes = 4, 8, 256, 2
    x = jax.random.normal(kx, (B, S, emb_size), jnp.float32)
    gamma, beta, w, bias = init_params(kp, emb_size, n_classes)

    params = prepare_params(gamma, beta, w, bias)       # one-time pad/cast
    out = classification_head(x, params)
    out = jax.block_until_ready(out)

    # Pure-JAX f32 reference.
    cls = x[:, 0, :]
    mean = cls.mean(-1, keepdims=True)
    var = ((cls - mean) ** 2).mean(-1, keepdims=True)
    ref = (cls - mean) / jnp.sqrt(var + 1e-5) * gamma + beta
    ref = ref @ w + bias

    assert out.shape == (B, n_classes)
    # bf16 MXU operands -> ~1e-2-level absolute error on logits is expected.
    err = float(jnp.max(jnp.abs(out - ref)))
    assert jnp.allclose(out, ref, atol=3e-2, rtol=3e-2), err

    print("KERNEL_OK")
</pallas_src>

<mosaic_0001>
module attributes {stable_mosaic.version = 11 : i64} {
  func.func @_cls_head_kernel(%arg0: i32, %arg1: memref<4x256xf32, #tpu.memory_space<vmem>>, %arg2: memref<1x256xf32, #tpu.memory_space<vmem>>, %arg3: memref<1x256xf32, #tpu.memory_space<vmem>>, %arg4: memref<256x128xbf16, #tpu.memory_space<vmem>>, %arg5: memref<1x128xf32, #tpu.memory_space<vmem>>, %arg6: memref<4x128xf32, #tpu.memory_space<vmem>>) attributes {dimension_semantics = [#tpu.dimension_semantics<parallel>], iteration_bounds = array<i64: 1>, scalar_prefetch = 0 : i64, scratch_operands = 0 : i64, tpu.core_type = #tpu.core_type<tc>, window_params = [{transform_indices = @transform_0, window_bounds = array<i64: 4, 256>}, {pipeline_mode = #tpu.pipeline_mode<synchronous>, transform_indices = @transform_1, window_bounds = array<i64: 1, 256>}, {pipeline_mode = #tpu.pipeline_mode<synchronous>, transform_indices = @transform_2, window_bounds = array<i64: 1, 256>}, {pipeline_mode = #tpu.pipeline_mode<synchronous>, transform_indices = @transform_3, window_bounds = array<i64: 256, 128>}, {pipeline_mode = #tpu.pipeline_mode<synchronous>, transform_indices = @transform_4, window_bounds = array<i64: 1, 128>}, {transform_indices = @transform_5, window_bounds = array<i64: 4, 128>}]} {
    %c0 = arith.constant 0 : index
    %c0_0 = arith.constant 0 : index
    %0 = vector.load %arg1[%c0, %c0_0] : memref<4x256xf32, #tpu.memory_space<vmem>>, vector<4x256xf32>
    %cst = arith.constant dense<0.000000e+00> : vector<4xf32>
    %1 = vector.multi_reduction <add>, %0, %cst [1] : vector<4x256xf32> to vector<4xf32>
    %2 = vector.shape_cast %1 : vector<4xf32> to vector<4x1xf32>
    %cst_1 = arith.constant 2.560000e+02 : f32
    %3 = vector.broadcast %cst_1 : f32 to vector<4x1xf32>
    %4 = arith.divf %2, %3 : vector<4x1xf32>
    %5 = vector.broadcast %4 : vector<4x1xf32> to vector<4x256xf32>
    %6 = arith.subf %0, %5 : vector<4x256xf32>
    %7 = arith.mulf %6, %6 : vector<4x256xf32>
    %cst_2 = arith.constant dense<0.000000e+00> : vector<4xf32>
    %8 = vector.multi_reduction <add>, %7, %cst_2 [1] : vector<4x256xf32> to vector<4xf32>
    %9 = vector.shape_cast %8 : vector<4xf32> to vector<4x1xf32>
    %cst_3 = arith.constant 2.560000e+02 : f32
    %10 = vector.broadcast %cst_3 : f32 to vector<4x1xf32>
    %11 = arith.divf %9, %10 : vector<4x1xf32>
    %cst_4 = arith.constant 9.99999974E-6 : f32
    %12 = vector.broadcast %cst_4 : f32 to vector<4x1xf32>
    %13 = arith.addf %11, %12 : vector<4x1xf32>
    %14 = math.rsqrt %13 : vector<4x1xf32>
    %c0_5 = arith.constant 0 : index
    %c0_6 = arith.constant 0 : index
    %15 = vector.load %arg2[%c0_5, %c0_6] : memref<1x256xf32, #tpu.memory_space<vmem>>, vector<1x256xf32>
    %16 = vector.broadcast %14 : vector<4x1xf32> to vector<4x256xf32>
    %17 = vector.broadcast %15 : vector<1x256xf32> to vector<4x256xf32>
    %18 = arith.mulf %16, %17 : vector<4x256xf32>
    %19 = arith.mulf %6, %18 : vector<4x256xf32>
    %c0_7 = arith.constant 0 : index
    %c0_8 = arith.constant 0 : index
    %20 = vector.load %arg3[%c0_7, %c0_8] : memref<1x256xf32, #tpu.memory_space<vmem>>, vector<1x256xf32>
    %21 = vector.broadcast %20 : vector<1x256xf32> to vector<4x256xf32>
    %22 = arith.addf %19, %21 : vector<4x256xf32>
    %23 = arith.truncf %22 : vector<4x256xf32> to vector<4x256xbf16>
    %c0_9 = arith.constant 0 : index
    %c0_10 = arith.constant 0 : index
    %24 = vector.load %arg4[%c0_9, %c0_10] : memref<256x128xbf16, #tpu.memory_space<vmem>>, vector<256x128xbf16>
    %cst_11 = arith.constant dense<0.000000e+00> : vector<4x128xf32>
    %25 = tpu.matmul %23, %24, %cst_11 {dimension_numbers = #tpu.dot_dimension_numbers<[1], [0], [0], [1], [0, 0, 1, 1], [], []>} : vector<4x256xbf16>, vector<256x128xbf16>, vector<4x128xf32> -> vector<4x128xf32>
    %c0_12 = arith.constant 0 : index
    %c0_13 = arith.constant 0 : index
    %26 = vector.load %arg5[%c0_12, %c0_13] : memref<1x128xf32, #tpu.memory_space<vmem>>, vector<1x128xf32>
    %27 = vector.broadcast %26 : vector<1x128xf32> to vector<4x128xf32>
    %28 = arith.addf %25, %27 : vector<4x128xf32>
    %c0_14 = arith.constant 0 : index
    %c0_15 = arith.constant 0 : index
    %29 = vector.load %arg6[%c0_14, %c0_15] : memref<4x128xf32, #tpu.memory_space<vmem>>, vector<4x128xf32>
    tpu.vector_store %arg6[%c0_14, %c0_15], %28 {strides = array<i32>} : memref<4x128xf32, #tpu.memory_space<vmem>>, vector<4x128xf32>,
    return
  }
  func.func @transform_0(%arg0: i32) -> (i32, i32) {
    %c0_i32 = arith.constant 0 : i32
    %c0_i32_0 = arith.constant 0 : i32
    return %arg0, %c0_i32 : i32, i32
  }
  func.func @transform_1(%arg0: i32) -> (i32, i32) {
    %c0_i32 = arith.constant 0 : i32
    %c0_i32_0 = arith.constant 0 : i32
    %c0_i32_1 = arith.constant 0 : i32
    return %c0_i32, %c0_i32_0 : i32, i32
  }
  func.func @transform_2(%arg0: i32) -> (i32, i32) {
    %c0_i32 = arith.constant 0 : i32
    %c0_i32_0 = arith.constant 0 : i32
    %c0_i32_1 = arith.constant 0 : i32
    return %c0_i32, %c0_i32_0 : i32, i32
  }
  func.func @transform_3(%arg0: i32) -> (i32, i32) {
    %c0_i32 = arith.constant 0 : i32
    %c0_i32_0 = arith.constant 0 : i32
    %c0_i32_1 = arith.constant 0 : i32
    return %c0_i32, %c0_i32_0 : i32, i32
  }
  func.func @transform_4(%arg0: i32) -> (i32, i32) {
    %c0_i32 = arith.constant 0 : i32
    %c0_i32_0 = arith.constant 0 : i32
    %c0_i32_1 = arith.constant 0 : i32
    return %c0_i32, %c0_i32_0 : i32, i32
  }
  func.func @transform_5(%arg0: i32) -> (i32, i32) {
    %c0_i32 = arith.constant 0 : i32
    %c0_i32_0 = arith.constant 0 : i32
    return %arg0, %c0_i32 : i32, i32
  }
}

</mosaic_0001>

<bundles_post_ra>
// kernel: tpu_custom_call.1
= control target key start
LH: loop header
LB: loop body
LE: loop exit
PB: predicated region body
PF: predicated region fallthrough
CT: control target
= control target key end

     0   :  { %10 = vsyncpa [#allocation3], 0  ;;  %s542_s0 = inlined_call_operand.hbm [shape: f32[4,2048], index: 0, kind: input, shape index: {}]   ;;  %s543_s1 = inlined_call_operand.vmem [shape: f32[1,256], index: 1, kind: input, shape index: {}]   ;;  %s544_s2 = inlined_call_operand.vmem [shape: f32[1,256], index: 2, kind: input, shape index: {}]   ;;  %s545_s3 = inlined_call_operand.hbm [shape: bf16[256,128], index: 3, kind: input, shape index: {}]   ;;  %s546_s4 = inlined_call_operand.vmem [shape: f32[1,128], index: 4, kind: input, shape index: {}]   ;;  %s547_s5 = inlined_call_operand.hbm [shape: f32[4,128], index: 5, kind: output, shape index: {}]  }
   0x1   :  { %11 = vsyncpa [#allocation6], 0 }
   0x2   :  { %12 = vsyncpa [#allocation4], 0  ;;  %s447_s18 = smov [#allocation2]   ;;  %s448_s20 = smov [#allocation5]  }
   0x3   :  { %s19_s19 = sshll.u32 %s447_s18, 4  ;;  %s32_s21 = sshll.u32 %s448_s20, 4  ;;  %s20_s19 = int_to_ptr.vmem [resolvable:$true] %s19_s19  ;;  %s483_s21 = int_to_ptr.vmem [resolvable:$true] %s32_s21 }
   0x4   :  { %s375_s24 = scalar_lea.hbm %s542_s0, 128  ;;  %s377_s29 = scalar_lea.hbm %s542_s0, 1024 }
   0x5   :  { %p376_p0 = scmp.ne.s32.totalorder %s542_s0, %s375_s24  ;;  %p378_p1 = scmp.lt.u32.totalorder %s377_s29, %s375_s24 }
   0x6   :  { %p379_p2 = scmp.lt.u32.totalorder %s375_s24, %s542_s0 }
   0x8   :  { %p380_p3 = por %p379_p2, %p378_p1 }
   0xa   :  { %p381_p4 = pnand %p380_p3, %p376_p0 }
   0xc   :  { %384 = shalt.err (!%p381_p4)
}
   0xd   :  { %s385_s7 = scalar_lea.vmem %s20_s19, 128  ;;  %p390_p6 = scmp.lt.s32.totalorder %s20_s19, %s20_s19 }
   0xe   :  { %p386_p5 = scmp.ne.s32.totalorder %s20_s19, %s385_s7  ;;  %p391_p7 = scmp.lt.s32.totalorder %s385_s7, %s385_s7 }
  0x10   :  { %p392_p8 = por %p391_p7, %p390_p6 }
  0x12   :  { %p393_p9 = pnand %p392_p8, %p386_p5 }
  0x14   :  { %396 = shalt.err (!%p393_p9)
}
  0x15   :  { %22 = dma.hbm_to_vmem [thread:$0]  %s542_s0, 128, %s20_s19, [#allocation3]  }
  0x16   :  { %s397_s12 = scalar_lea.hbm %s545_s3, 2048 }
  0x17   :  { %p398_p10 = scmp.ne.s32.totalorder %s545_s3, %s397_s12  ;;  %p401_p11 = scmp.lt.u32.totalorder %s397_s12, %s545_s3 }
  0x19   :  { %p403_p12 = pnand %p401_p11, %p398_p10 }
  0x1b   :  { %406 = shalt.err (!%p403_p12)
}
  0x1c   :  { %s407_s17 = scalar_lea.vmem %s483_s21, 2048  ;;  %p412_p0 = scmp.lt.s32.totalorder %s483_s21, %s483_s21 }
  0x1d   :  { %p408_p13 = scmp.ne.s32.totalorder %s483_s21, %s407_s17  ;;  %p413_p1 = scmp.lt.s32.totalorder %s407_s17, %s407_s17 }
  0x1f   :  { %p414_p2 = por %p413_p1, %p412_p0 }
  0x21   :  { %p415_p3 = pnand %p414_p2, %p408_p13 }
  0x23   :  { %418 = shalt.err (!%p415_p3)
}
  0x24   :  { %s449_s0 = smov 64   ;;  %s450_s18 = smov 4  }
  0x25   :  { %38 = dma.hbm_to_vmem [thread:$0]  %s545_s3, 2048, %s483_s21, [#allocation6], %s449_s0, %s449_s0, %s450_s18  }
  0x26   :  { %441 = dma.done.wait [#allocation3], 128  }
  0x27   :  { %442 = vsyncadd [#allocation3], 4294967168 }
  0x28   :  { %443 = dma.done.wait [#allocation6], 2048  }
  0x29   :  { %444 = vsyncadd [#allocation6], 4294965248  ;;  %vm52_vm0 = vcmask 1043456   ;;  %v48_v0 = vld [vmem:[#allocation2] sm:$0xff]  ;;  %v357_v5 = vld [vmem:[#allocation5 + $0x40] sm:$0xff]   ;;  %v64_v9 = vlaneseq }
  0x2a   :  { %v50_v1 = vcombine.high %v48_v0, %v48_v0  ;;  %v53_v2 = vsel %vm52_vm0, %v48_v0, 0.0  ;;  %v358_v6 = vld [vmem:[#allocation5] sm:$0xff]   ;;  %328 = vmatprep.subr.bf16.mxu0 %v357_v5  ;;  %v451_v7 = vmov 839922192   ;;  %v359_v22 = vld [vmem:[#allocation5 + $0x48] sm:$0xff]   ;;  %v361_v24 = vld [vmem:[#allocation5 + $0x50] sm:$0xff]  }
  0x2b   :  { %329 = vmatpush3.bf16.msra.mxu0 %v358_v6  ;;  %v62_v8 = vunpack.c.l.s4 %v451_v7  ;;  %v65_v11 = vshrl.u32 %v64_v9, 7  ;;  %v360_v23 = vld [vmem:[#allocation5 + $0x8] sm:$0xff]   ;;  %v362_v25 = vld [vmem:[#allocation5 + $0x10] sm:$0xff]   ;;  %v363_v26 = vld [vmem:[#allocation5 + $0x58] sm:$0xff]  }
  0x2c   :  { %v54_v3 = vsel %vm52_vm0, %v50_v1, 0.0  ;;  %330 = vmatprep.subr.bf16.mxu0 %v359_v22  ;;  %v364_v27 = vld [vmem:[#allocation5 + $0x18] sm:$0xff]   ;;  %v365_v28 = vld [vmem:[#allocation5 + $0x60] sm:$0xff]   ;;  %v367_v30 = vld [vmem:[#allocation5 + $0x68] sm:$0xff]  }
  0x2d   :  { %v55_v4 = vadd.f32 %v54_v3, %v53_v2  ;;  %v63_v10 = vunpack.c.0.s8 %v62_v8  ;;  %v366_v29 = vld [vmem:[#allocation5 + $0x20] sm:$0xff]   ;;  %v368_v31 = vld [vmem:[#allocation5 + $0x28] sm:$0xff]   ;;  %v369_v32 = vld [vmem:[#allocation5 + $0x70] sm:$0xff]   ;;  %v86_v39 = vsub.s32 0, %v65_v11  ;;  %v90_v40 = vsub.s32 1, %v65_v11 }
  0x2e   :  { %v370_v33 = vld [vmem:[#allocation5 + $0x30] sm:$0xff]   ;;  %v371_v34 = vld [vmem:[#allocation5 + $0x78] sm:$0xff]  }
  0x2f   :  { %56 = vadd.xlane.f32.xlu0 %v55_v4  ;;  %v66_v12 = vsub.s32 %v63_v10, %v65_v11  ;;  %331 = vmatpush3.bf16.msra.mxu0 %v360_v23  ;;  %v372_v35 = vld [vmem:[#allocation5 + $0x38] sm:$0xff]  }
  0x30   :  { %332 = vmatprep.subr.bf16.mxu0 %v361_v24  ;;  %v82_v41 = vld [vmem:[%s543_s1] sm:$0x3] }
  0x31   :  { %v101_v42 = vld [vmem:[%s544_s2] sm:$0x3]  ;;  %v87_v43 = vrot.slane %v82_v41, %v86_v39  ;;  %v91_v44 = vrot.slane %v82_v41, %v90_v40  ;;  %s452_s2 = smov [#allocation7]  }
  0x32   :  { %v106_v45 = vrot.slane %v101_v42, %v86_v39  ;;  %v110_v46 = vrot.slane %v101_v42, %v90_v40  ;;  %v311_v58 = vld [vmem:[%s546_s4] ss:$0 sm:$0xff]  ;;  %s301_s25 = sshll.u32 %s452_s2, 4  ;;  %s302_s25 = int_to_ptr.vmem [resolvable:$true] %s301_s25 }
  0x33   :  { %333 = vmatpush3.bf16.msra.mxu0 %v362_v25  ;;  %s419_s26 = scalar_lea.vmem %s302_s25, 64  ;;  %p424_p5 = scmp.lt.s32.totalorder %s302_s25, %s302_s25 }
  0x34   :  { %334 = vmatprep.subr.bf16.mxu0 %v363_v26  ;;  %v111_v51 = vcombine.low %v106_v45, %v110_v46  ;;  %p420_p4 = scmp.ne.s32.totalorder %s302_s25, %s419_s26  ;;  %p425_p6 = scmp.lt.s32.totalorder %s419_s26, %s419_s26 }
  0x36   :  { %p426_p7 = por %p425_p6, %p424_p5 }
  0x37   :  { %335 = vmatpush3.bf16.msra.mxu0 %v364_v27 }
  0x38   :  { %336 = vmatprep.subr.bf16.mxu0 %v365_v28  ;;  %p427_p8 = pnand %p426_p7, %p420_p4 }
  0x3b   :  { %337 = vmatpush3.bf16.msra.mxu0 %v366_v29 }
  0x3c   :  { %338 = vmatprep.subr.bf16.mxu0 %v367_v30 }
  0x3f   :  { %339 = vmatpush3.bf16.msra.mxu0 %v368_v31 }
  0x40   :  { %340 = vmatprep.subr.bf16.mxu0 %v369_v32 }
  0x43   :  { %341 = vmatpush3.bf16.msra.mxu0 %v370_v33 }
  0x44   :  { %342 = vmatprep.subr.bf16.mxu0 %v371_v34 }
  0x47   :  { %343 = vmatpush3.bf16.msra.mxu0 %v372_v35 }
  0xbc   :  { %v57_v13 = vpop.xlane.xlu0 %56 }
  0xbd   :  { %v59_v14 = vmul.f32 0.00390625, %v57_v13 }
  0xbf   :  { %v67_v15 = vrot.slane %v59_v14, %v66_v12 }
  0xc1   :  { %v69_v16 = vsub.f32 %v48_v0, %v67_v15 }
  0xc3   :  { %v70_v17 = vmul.f32 %v69_v16, %v69_v16 }
  0xc5   :  { %v72_v18 = vcombine.high %v70_v17, %v70_v17  ;;  %v74_v19 = vsel %vm52_vm0, %v70_v17, 0.0 }
  0xc7   :  { %v75_v20 = vsel %vm52_vm0, %v72_v18, 0.0 }
  0xc8   :  { %v76_v21 = vadd.f32 %v75_v20, %v74_v19 }
  0xca   :  { %77 = vadd.xlane.f32.xlu0 %v76_v21 }
 0x157   :  { %v78_v36 = vpop.xlane.xlu0 %77 }
 0x158   :  { %v79_v37 = vmul.f32 0.00390625, %v78_v36 }
 0x15a   :  { %v80_v38 = vadd.f32 1e-05, %v79_v37 }
 0x15c   :  { %373 = vrsqrt.f32 %v80_v38 }
 0x166   :  { %v374_v47 = vpop.eup %373 }
 0x167   :  { %v94_v48 = vmul.f32 %v374_v47, %v87_v43  ;;  %v95_v49 = vmul.f32 %v374_v47, %v91_v44 }
 0x169   :  { %v98_v50 = vcombine.low %v94_v48, %v95_v49 }
 0x16b   :  { %v100_v52 = vmul.f32 %v98_v50, %v69_v16 }
 0x16d   :  { %v113_v53 = vadd.f32 %v111_v51, %v100_v52 }
 0x16f   :  { %v115_v54 = vcombine.high %v113_v53, %v113_v53  ;;  %v117_v56 = vpack.c.bf16 %v113_v53, %v113_v53 }
 0x171   :  { %v118_v55 = vpack.c.bf16 %v115_v54, %v115_v54 }
 0x173   :  { %286 = vmatprep.mubr.bf16.mxu0 %v118_v55 }
 0x174   :  { %287 = vmatmul.mubr.bf16.vlgmr.msra.gmra.mrb[0].mxu0 %v117_v56 }
 0x247   :  { %v344_v57 = vpop.f32.mrb[0].mxu0 }
 0x248   :  { %v345_v59 = vpop.f32.mrb[1].mxu0 }
 0x249   :  { %v346_v60 = vadd.f32 %v345_v59, %v344_v57  ;;  %v347_v61 = vpop.f32.mrb[2].mxu0 }
 0x24a   :  { %v348_v62 = vpop.f32.mrb[3].mxu0 }
 0x24b   :  { %v289_v63 = vadd.f32 %v346_v60, %v311_v58 }
 0x24d   :  { %294 = vst [vmem:[#allocation7] sm:$0xf] %v289_v63 }
 0x24e   :  { %430 = shalt.err (!%p427_p8)
}
 0x24f   :  { %s431_s4 = scalar_lea.hbm %s547_s5, 64 }
 0x250   :  { %p432_p9 = scmp.ne.s32.totalorder %s547_s5, %s431_s4  ;;  %p435_p10 = scmp.lt.u32.totalorder %s431_s4, %s547_s5 }
 0x252   :  { %p437_p11 = pnand %p435_p10, %p432_p9 }
 0x254   :  { %440 = shalt.err (!%p437_p11)
}
 0x255   :  { %304 = dma.vmem_to_hbm [thread:$0]  %s302_s25, 64, %s547_s5, [#allocation4]  }
 0x256   :  { %445 = dma.done.wait [#allocation4], 64  }
 0x257   :  { %446 = vsyncadd [#allocation4], 4294967232 }
 0x258   :  { %308 = vsyncpa [#allocation3], 1 }
 0x259   :  { %309 = vsyncpa [#allocation6], 1 }
 0x25a   :  { %310 = vsyncpa [#allocation4], 1 }

</bundles_post_ra>
